<compile_context>
chip_gen: v7x
topology: tpu7x:2x2x1
jax: 0.10.0
libtpu: 0.0.40
codegen_flags: <defaults>
</compile_context>

<pallas_src>
import functools

import jax
import jax.numpy as jnp
from jax.experimental import pallas as pl
from jax.experimental.pallas import tpu as pltpu

F_MOBILE = 32        # stand-in for num_features_mobile (1280 in the real model)
F_PIT = 24           # stand-in for num_features_pit    (1024 in the real model)
NUM_CLASSES = 5
PATCH = 4

FEAT_PAD = 128       # lane-dense padded width per feature path
HEAD_PAD = 128       # lane-dense padded width of the classifier output (>= NUM_CLASSES)


# ---------------------------------------------------------------------------
# Host-side glue (single shared data reorganization + weight padding)
# ---------------------------------------------------------------------------
def _extract_patches(x_nchw, patch):
    """NCHW -> [B, P, patch*patch*C] (pixel-major within each patch). One pass over x."""
    B, C, H, W = x_nchw.shape
    hp, wp = H // patch, W // patch
    xp = x_nchw.reshape(B, C, hp, patch, wp, patch)
    xp = jnp.transpose(xp, (0, 2, 4, 3, 5, 1))            # [B, hp, wp, p, p, C]
    return xp.reshape(B, hp * wp, patch * patch * C)


def _pad_cols(a, width):
    return jnp.pad(a, ((0, 0), (0, width - a.shape[1])))


def _pad_rows(a, height):
    return jnp.pad(a, ((0, height - a.shape[0]), (0, 0)))


def _prepare_params(params):
    """Zero-pad + concatenate weights into lane-dense, kernel-ready slabs."""
    # Feature-path weights: [D, 2*FEAT_PAD]; lanes [0,128) = mobile, [128,256) = pit.
    wf = jnp.concatenate(
        [_pad_cols(params["w_mobile"], FEAT_PAD), _pad_cols(params["w_pit"], FEAT_PAD)],
        axis=1)
    bf = jnp.concatenate(
        [_pad_cols(params["b_mobile"], FEAT_PAD), _pad_cols(params["b_pit"], FEAT_PAD)],
        axis=1)
    # Head: concat([feat_m, feat_p]) @ w_fc + b_fc, expressed on the padded feature layout.
    w_fc = params["w_fc"]
    wh_m = _pad_rows(_pad_cols(w_fc[:F_MOBILE, :], HEAD_PAD), FEAT_PAD)
    wh_p = _pad_rows(_pad_cols(w_fc[F_MOBILE:, :], HEAD_PAD), FEAT_PAD)
    wh = jnp.concatenate([wh_m, wh_p], axis=0)             # [2*FEAT_PAD, HEAD_PAD]
    bh = _pad_cols(params["b_fc"], HEAD_PAD)               # [1, HEAD_PAD]
    return (wf.astype(jnp.bfloat16),
            bf.astype(jnp.float32),
            wh.astype(jnp.float32),
            bh.astype(jnp.float32))


# ---------------------------------------------------------------------------
# Fused kernel: both feature paths + pooling + fused Linear head
# ---------------------------------------------------------------------------
def _fused_kernel(x_ref, wf_ref, bf_ref, wh_ref, bh_ref, o_ref, acc_ref, *, inv_p):
    # x_ref:  [TP, D]            bf16 patch rows for the current (batch, tile)
    # wf_ref: [D, 2*FEAT_PAD]    bf16 fused feature weights (mobile | pit)
    # bf_ref: [1, 2*FEAT_PAD]    f32 fused feature bias
    # wh_ref: [2*FEAT_PAD, HEAD_PAD]  f32 fused classifier weights
    # bh_ref: [1, HEAD_PAD]      f32 classifier bias
    # o_ref:  [1, HEAD_PAD]      f32 padded logits for this batch element
    # acc_ref:[1, 2*FEAT_PAD]    f32 running sum of activations over patches
    t = pl.program_id(1)

    @pl.when(t == 0)
    def _init():
        acc_ref[...] = jnp.zeros_like(acc_ref)

    # One MXU matmul feeds both feature paths (bf16 inputs, f32 accumulation).
    h = jnp.dot(x_ref[...], wf_ref[...], preferred_element_type=jnp.float32)
    h = h + bf_ref[...]
    h_m = jnp.clip(h[:, :FEAT_PAD], 0.0, 6.0)                       # ReLU6 (mobile path)
    h_p = jax.nn.gelu(h[:, FEAT_PAD:], approximate=True)            # GELU  (pit path)
    act = jnp.concatenate([h_m, h_p], axis=1)
    acc_ref[...] += jnp.sum(act, axis=0, keepdims=True)             # streaming pool

    @pl.when(t == pl.num_programs(1) - 1)
    def _finalize():
        feat = acc_ref[...] * inv_p                                  # mean over all patches
        out = jnp.dot(feat, wh_ref[...], preferred_element_type=jnp.float32)
        o_ref[...] = out + bh_ref[...]                               # lane-dense [1, 128]


# ---------------------------------------------------------------------------
# Forward wrapper
# ---------------------------------------------------------------------------
def combined_model_forward(x_nchw, params, *, row_tile=None):
    B, C, H, W = x_nchw.shape
    xp = _extract_patches(x_nchw, PATCH)        # single shared reorganization of x
    _, P, D = xp.shape
    xp = xp.astype(jnp.bfloat16)                # halves HBM traffic on the mem-bound stream
    wf, bf, wh, bh = _prepare_params(params)

    if row_tile is None:
        row_tile = min(P, 512)                  # big tiles -> near HBM roofline at real sizes
    assert P % row_tile == 0, (P, row_tile)
    grid = (B, P // row_tile)                   # batch parallel, patch-tile reduction

    kernel = functools.partial(_fused_kernel, inv_p=1.0 / P)
    out = pl.pallas_call(
        kernel,
        out_shape=jax.ShapeDtypeStruct((B, 1, HEAD_PAD), jnp.float32),
        grid_spec=pltpu.PrefetchScalarGridSpec(
            num_scalar_prefetch=0,
            grid=grid,
            in_specs=[
                # Streamed input tiles.
                pl.BlockSpec((None, row_tile, D), lambda b, t: (b, t, 0)),
                # Weights/bias: constant block index -> DMA'd once, VMEM-resident.
                pl.BlockSpec((D, 2 * FEAT_PAD), lambda b, t: (0, 0)),
                pl.BlockSpec((1, 2 * FEAT_PAD), lambda b, t: (0, 0)),
                pl.BlockSpec((2 * FEAT_PAD, HEAD_PAD), lambda b, t: (0, 0)),
                pl.BlockSpec((1, HEAD_PAD), lambda b, t: (0, 0)),
            ],
            out_specs=pl.BlockSpec((None, 1, HEAD_PAD), lambda b, t: (b, 0, 0)),
            scratch_shapes=[pltpu.VMEM((1, 2 * FEAT_PAD), jnp.float32)],
        ),
        compiler_params=pltpu.CompilerParams(
            dimension_semantics=("parallel", "arbitrary"),   # batch across TCs on v7x
            vmem_limit_bytes=32 * 1024 * 1024,
        ),
    )(xp, wf, bf, wh, bh)
    return out[:, 0, :NUM_CLASSES]


# ---------------------------------------------------------------------------
# Parameter init + pure-JAX reference (for a numerical sanity check)
# ---------------------------------------------------------------------------
def init_params(key, in_channels=3):
    k = jax.random.split(key, 6)
    patch_dim = in_channels * PATCH * PATCH
    scale = 0.02
    return {
        "w_mobile": scale * jax.random.normal(k[0], (patch_dim, F_MOBILE), jnp.float32),
        "b_mobile": scale * jax.random.normal(k[1], (1, F_MOBILE), jnp.float32),
        "w_pit":    scale * jax.random.normal(k[2], (patch_dim, F_PIT), jnp.float32),
        "b_pit":    scale * jax.random.normal(k[3], (1, F_PIT), jnp.float32),
        "w_fc":     scale * jax.random.normal(k[4], (F_MOBILE + F_PIT, NUM_CLASSES), jnp.float32),
        "b_fc":     scale * jax.random.normal(k[5], (1, NUM_CLASSES), jnp.float32),
    }


def reference_forward(x_nchw, params):
    """Pure-JAX mirror of the fused kernel math (same bf16 casts), for validation."""
    xp = _extract_patches(x_nchw, PATCH).astype(jnp.bfloat16).astype(jnp.float32)
    wf, bf, wh, bh = _prepare_params(params)
    h = jnp.einsum("bpd,df->bpf", xp, wf.astype(jnp.float32)) + bf
    h_m = jnp.clip(h[..., :FEAT_PAD], 0.0, 6.0)
    h_p = jax.nn.gelu(h[..., FEAT_PAD:], approximate=True)
    feat = jnp.mean(jnp.concatenate([h_m, h_p], axis=-1), axis=1)
    out = feat @ wh + bh
    return out[:, :NUM_CLASSES]


if __name__ == "__main__":
    key = jax.random.PRNGKey(0)
    k_x, k_p = jax.random.split(key)
    # Small NCHW input consistent with an image model: batch=2, channels=3, 32x32 spatial
    # -> 64 patches of 4x4, so the grid reduction runs 4 accumulation steps per batch.
    x = jax.random.normal(k_x, (2, 3, 32, 32), dtype=jnp.float32)
    params = init_params(k_p, in_channels=3)

    out = combined_model_forward(x, params, row_tile=16)
    out = jax.block_until_ready(out)
    assert out.shape == (2, NUM_CLASSES), out.shape

    ref = jax.block_until_ready(reference_forward(x, params))
    assert bool(jnp.all(jnp.isfinite(out)))
    assert bool(jnp.allclose(out, ref, rtol=1e-2, atol=1e-4)), (out, ref)
    print("KERNEL_OK")
</pallas_src>

<mosaic_0001>
module attributes {stable_mosaic.version = 11 : i64} {
  func.func @_fused_kernel(%arg0: i32, %arg1: i32, %arg2: memref<1x16x48xbf16, #tpu.memory_space<vmem>>, %arg3: memref<48x256xbf16, #tpu.memory_space<vmem>>, %arg4: memref<1x256xf32, #tpu.memory_space<vmem>>, %arg5: memref<256x128xf32, #tpu.memory_space<vmem>>, %arg6: memref<1x128xf32, #tpu.memory_space<vmem>>, %arg7: memref<1x1x128xf32, #tpu.memory_space<vmem>>, %arg8: memref<1x256xf32, #tpu.memory_space<vmem>>) attributes {dimension_semantics = [#tpu.dimension_semantics<parallel>, #tpu.dimension_semantics<arbitrary>], iteration_bounds = array<i64: 2, 4>, scalar_prefetch = 0 : i64, scratch_operands = 1 : i64, tpu.core_type = #tpu.core_type<tc>, window_params = [{transform_indices = @transform_0, window_bounds = array<i64: 1, 16, 48>}, {pipeline_mode = #tpu.pipeline_mode<synchronous>, transform_indices = @transform_1, window_bounds = array<i64: 48, 256>}, {pipeline_mode = #tpu.pipeline_mode<synchronous>, transform_indices = @transform_2, window_bounds = array<i64: 1, 256>}, {pipeline_mode = #tpu.pipeline_mode<synchronous>, transform_indices = @transform_3, window_bounds = array<i64: 256, 128>}, {pipeline_mode = #tpu.pipeline_mode<synchronous>, transform_indices = @transform_4, window_bounds = array<i64: 1, 128>}, {transform_indices = @transform_5, window_bounds = array<i64: 1, 1, 128>}]} {
    %c0_i32 = arith.constant 0 : i32
    %0 = arith.cmpi eq, %arg1, %c0_i32 : i32
    %1 = arith.extui %0 : i1 to i32
    %c0_i32_0 = arith.constant 0 : i32
    %2 = arith.cmpi ne, %1, %c0_i32_0 : i32
    scf.if %2 {
      %cst_19 = arith.constant 0.000000e+00 : f32
      %38 = vector.broadcast %cst_19 : f32 to vector<1x256xf32>
      %c0_20 = arith.constant 0 : index
      %c0_21 = arith.constant 0 : index
      %39 = vector.load %arg8[%c0_20, %c0_21] : memref<1x256xf32, #tpu.memory_space<vmem>>, vector<1x256xf32>
      tpu.vector_store %arg8[%c0_20, %c0_21], %38 {strides = array<i32>} : memref<1x256xf32, #tpu.memory_space<vmem>>, vector<1x256xf32>,
    } else {
    }
    %c0 = arith.constant 0 : index
    %c0_1 = arith.constant 0 : index
    %c0_2 = arith.constant 0 : index
    %3 = vector.load %arg2[%c0, %c0_1, %c0_2] : memref<1x16x48xbf16, #tpu.memory_space<vmem>>, vector<1x16x48xbf16>
    %4 = vector.shape_cast %3 : vector<1x16x48xbf16> to vector<16x48xbf16>
    %c0_3 = arith.constant 0 : index
    %c0_4 = arith.constant 0 : index
    %5 = vector.load %arg3[%c0_3, %c0_4] : memref<48x256xbf16, #tpu.memory_space<vmem>>, vector<48x256xbf16>
    %cst = arith.constant dense<0.000000e+00> : vector<16x256xf32>
    %6 = tpu.matmul %4, %5, %cst {dimension_numbers = #tpu.dot_dimension_numbers<[1], [0], [0], [1], [0, 0, 1, 1], [], []>} : vector<16x48xbf16>, vector<48x256xbf16>, vector<16x256xf32> -> vector<16x256xf32>
    %c0_5 = arith.constant 0 : index
    %c0_6 = arith.constant 0 : index
    %7 = vector.load %arg4[%c0_5, %c0_6] : memref<1x256xf32, #tpu.memory_space<vmem>>, vector<1x256xf32>
    %8 = vector.broadcast %7 : vector<1x256xf32> to vector<16x256xf32>
    %9 = arith.addf %6, %8 : vector<16x256xf32>
    %10 = vector.extract_strided_slice %9 {offsets = [0, 0], sizes = [16, 128], strides = [1, 1]} : vector<16x256xf32> to vector<16x128xf32>
    %cst_7 = arith.constant 0.000000e+00 : f32
    %cst_8 = arith.constant 6.000000e+00 : f32
    %11 = vector.broadcast %cst_7 : f32 to vector<16x128xf32>
    %12 = arith.maximumf %11, %10 : vector<16x128xf32>
    %13 = vector.broadcast %cst_8 : f32 to vector<16x128xf32>
    %14 = arith.minimumf %13, %12 : vector<16x128xf32>
    %15 = vector.extract_strided_slice %9 {offsets = [0, 128], sizes = [16, 128], strides = [1, 1]} : vector<16x256xf32> to vector<16x128xf32>
    %16 = arith.mulf %15, %15 : vector<16x128xf32>
    %17 = arith.mulf %15, %16 : vector<16x128xf32>
    %cst_9 = arith.constant 4.471500e-02 : f32
    %18 = vector.broadcast %cst_9 : f32 to vector<16x128xf32>
    %19 = arith.mulf %18, %17 : vector<16x128xf32>
    %20 = arith.addf %15, %19 : vector<16x128xf32>
    %cst_10 = arith.constant 0.797884583 : f32
    %21 = vector.broadcast %cst_10 : f32 to vector<16x128xf32>
    %22 = arith.mulf %21, %20 : vector<16x128xf32>
    %23 = math.tanh %22 : vector<16x128xf32>
    %cst_11 = arith.constant 1.000000e+00 : f32
    %24 = vector.broadcast %cst_11 : f32 to vector<16x128xf32>
    %25 = arith.addf %24, %23 : vector<16x128xf32>
    %cst_12 = arith.constant 5.000000e-01 : f32
    %26 = vector.broadcast %cst_12 : f32 to vector<16x128xf32>
    %27 = arith.mulf %26, %25 : vector<16x128xf32>
    %28 = arith.mulf %15, %27 : vector<16x128xf32>
    %29 = tpu.concatenate %14, %28 in 1 : vector<16x128xf32>, vector<16x128xf32> -> vector<16x256xf32>
    %c0_13 = arith.constant 0 : index
    %c0_14 = arith.constant 0 : index
    %30 = vector.load %arg8[%c0_13, %c0_14] : memref<1x256xf32, #tpu.memory_space<vmem>>, vector<1x256xf32>
    %cst_15 = arith.constant dense<0.000000e+00> : vector<256xf32>
    %31 = vector.multi_reduction <add>, %29, %cst_15 [0] : vector<16x256xf32> to vector<256xf32>
    %32 = vector.shape_cast %31 : vector<256xf32> to vector<1x256xf32>
    %33 = arith.addf %30, %32 : vector<1x256xf32>
    %c0_16 = arith.constant 0 : index
    %c0_17 = arith.constant 0 : index
    %34 = vector.load %arg8[%c0_16, %c0_17] : memref<1x256xf32, #tpu.memory_space<vmem>>, vector<1x256xf32>
    tpu.vector_store %arg8[%c0_16, %c0_17], %33 {strides = array<i32>} : memref<1x256xf32, #tpu.memory_space<vmem>>, vector<1x256xf32>,
    %c3_i32 = arith.constant 3 : i32
    %35 = arith.cmpi eq, %arg1, %c3_i32 : i32
    %36 = arith.extui %35 : i1 to i32
    %c0_i32_18 = arith.constant 0 : i32
    %37 = arith.cmpi ne, %36, %c0_i32_18 : i32
    scf.if %37 {
      %c0_19 = arith.constant 0 : index
      %c0_20 = arith.constant 0 : index
      %38 = vector.load %arg8[%c0_19, %c0_20] : memref<1x256xf32, #tpu.memory_space<vmem>>, vector<1x256xf32>
      %cst_21 = arith.constant 1.562500e-02 : f32
      %39 = vector.broadcast %cst_21 : f32 to vector<1x256xf32>
      %40 = arith.mulf %38, %39 : vector<1x256xf32>
      %c0_22 = arith.constant 0 : index
      %c0_23 = arith.constant 0 : index
      %41 = vector.load %arg5[%c0_22, %c0_23] : memref<256x128xf32, #tpu.memory_space<vmem>>, vector<256x128xf32>
      %cst_24 = arith.constant dense<0.000000e+00> : vector<1x128xf32>
      %42 = tpu.matmul %40, %41, %cst_24 {dimension_numbers = #tpu.dot_dimension_numbers<[1], [0], [0], [1], [0, 0, 1, 1], [], []>} : vector<1x256xf32>, vector<256x128xf32>, vector<1x128xf32> -> vector<1x128xf32>
      %c0_25 = arith.constant 0 : index
      %c0_26 = arith.constant 0 : index
      %43 = vector.load %arg6[%c0_25, %c0_26] : memref<1x128xf32, #tpu.memory_space<vmem>>, vector<1x128xf32>
      %44 = arith.addf %42, %43 : vector<1x128xf32>
      %c0_27 = arith.constant 0 : index
      %c0_28 = arith.constant 0 : index
      %c0_29 = arith.constant 0 : index
      %45 = vector.load %arg7[%c0_27, %c0_28, %c0_29] : memref<1x1x128xf32, #tpu.memory_space<vmem>>, vector<1x1x128xf32>
      %46 = vector.shape_cast %45 : vector<1x1x128xf32> to vector<1x128xf32>
      %47 = vector.shape_cast %44 : vector<1x128xf32> to vector<1x1x128xf32>
      tpu.vector_store %arg7[%c0_27, %c0_28, %c0_29], %47 {strides = array<i32>} : memref<1x1x128xf32, #tpu.memory_space<vmem>>, vector<1x1x128xf32>,
    } else {
    }
    return
  }
  func.func @transform_0(%arg0: i32, %arg1: i32) -> (i32, i32, i32) {
    %c0_i32 = arith.constant 0 : i32
    %c0_i32_0 = arith.constant 0 : i32
    return %arg0, %arg1, %c0_i32 : i32, i32, i32
  }
  func.func @transform_1(%arg0: i32, %arg1: i32) -> (i32, i32) {
    %c0_i32 = arith.constant 0 : i32
    %c0_i32_0 = arith.constant 0 : i32
    %c0_i32_1 = arith.constant 0 : i32
    return %c0_i32, %c0_i32_0 : i32, i32
  }
  func.func @transform_2(%arg0: i32, %arg1: i32) -> (i32, i32) {
    %c0_i32 = arith.constant 0 : i32
    %c0_i32_0 = arith.constant 0 : i32
    %c0_i32_1 = arith.constant 0 : i32
    return %c0_i32, %c0_i32_0 : i32, i32
  }
  func.func @transform_3(%arg0: i32, %arg1: i32) -> (i32, i32) {
    %c0_i32 = arith.constant 0 : i32
    %c0_i32_0 = arith.constant 0 : i32
    %c0_i32_1 = arith.constant 0 : i32
    return %c0_i32, %c0_i32_0 : i32, i32
  }
  func.func @transform_4(%arg0: i32, %arg1: i32) -> (i32, i32) {
    %c0_i32 = arith.constant 0 : i32
    %c0_i32_0 = arith.constant 0 : i32
    %c0_i32_1 = arith.constant 0 : i32
    return %c0_i32, %c0_i32_0 : i32, i32
  }
  func.func @transform_5(%arg0: i32, %arg1: i32) -> (i32, i32, i32) {
    %c0_i32 = arith.constant 0 : i32
    %c0_i32_0 = arith.constant 0 : i32
    %c0_i32_1 = arith.constant 0 : i32
    return %arg0, %c0_i32, %c0_i32_0 : i32, i32, i32
  }
}

</mosaic_0001>

<bundles_post_ra>
// kernel: tpu_custom_call.1
= control target key start
LH: loop header
LB: loop body
LE: loop exit
PB: predicated region body
PF: predicated region fallthrough
CT: control target
= control target key end

     0   :  { %10 = vsyncpa [#allocation4], 0  ;;  %s1224_s0 = inlined_call_operand.vmem [shape: bf16[2,64,48], index: 0, kind: input, shape index: {}]   ;;  %s1225_s1 = inlined_call_operand.vmem [shape: bf16[48,256], index: 1, kind: input, shape index: {}]   ;;  %s1226_s2 = inlined_call_operand.vmem [shape: f32[1,256], index: 2, kind: input, shape index: {}]   ;;  %s1227_s3 = inlined_call_operand.hbm [shape: f32[256,128], index: 3, kind: input, shape index: {}]   ;;  %s1228_s4 = inlined_call_operand.vmem [shape: f32[1,128], index: 4, kind: input, shape index: {}]   ;;  %s1229_s5 = inlined_call_operand.hbm [shape: f32[2,1,128], index: 5, kind: output, shape index: {}]  }
   0x1   :  { %11 = vsyncpa [#allocation5], 0 }
   0x2   :  { %13 = vsyncpa [#allocation5 + $0x1], 0  ;;  %s1012_s18 = smov 0   ;;  %s1014_s19 = smov 0  }
   0x3   :  { %s1016_s20 = smov 0   ;;  %s1018_s21 = smov 0  }
   0x4   :  { %s1020_s22 = smov 0   ;;  %s1022_s23 = smov 0  }
   0x5   :  { %s1024_s24 = smov 0   ;;  %s1026_s25 = smov 0  }
   0x6 LB: > { %s656_s26 = sadd.s32 4294967295, %s973_s25   ;;  %s657_s27 = sadd.s32 4294967294, %s973_s25   ;;  %s973_s25 = sphi %s1026_s25, %s19_s25   ;;  %s969_s24 = sphi %s1024_s24, %s1249_s24   ;;  %s965_s23 = sphi %s1022_s23, %s1248_s23   ;;  %s961_s22 = sphi %s1020_s22, %s1247_s22   ;;  %s957_s21 = sphi %s1018_s21, %s1246_s21   ;;  %s953_s20 = sphi %s1016_s20, %s1245_s20   ;;  %s949_s19 = sphi %s1014_s19, %s1244_s19   ;;  %s945_s18 = sphi %s1012_s18, %s1243_s18  }
   0x7   : > { %s28_s28 = sadd.s32 1, %s965_s23  ;;  %s31_s29 = sadd.s32 1, %s969_s24 }
   0x8   : > { %p29_p0 = scmp.ge.s32.totalorder %s28_s28, 4  ;;  %s150_s30 = sadd.s32 1, %s953_s20 }
   0x9   : > { %p160_p1 = scmp.ne.s32.totalorder %s953_s20, %s949_s19  ;;  %p161_p2 = scmp.eq.s32.totalorder %s656_s26, 7 }
   0xa   : > { %s1251_s28 = smov (%p29_p0, %s28_s28), 0  ;;  %s1253_s29 = smov (!%p29_p0, %s31_s29), %s969_s24 }
   0xb   : > { %p1062_p3 = por %p161_p2, %p160_p1  ;;  %p166_p4 = scmp.ne.s32.totalorder %s949_s19, %s945_s18 }
   0xc   : > { %p33_p5 = scmp.ge.s32.totalorder %s1253_s29, 2  ;;  %p167_p6 = scmp.eq.s32.totalorder %s657_s27, 7 }
   0xd   : > { %s1234_s6 = scalar_select %p1062_p3, 1, 0 }
   0xe   : > { %p658_p7 = scmp.ge.s32.totalorder %s973_s25, 1  ;;  %p174_p8 = scmp.lt.s32.totalorder %s973_s25, 9 }
   0xf   : > { %s1255_s29 = smov (%p33_p5, %s1253_s29), 0  ;;  %p1072_p9 = por %p167_p6, %p166_p4 }
  0x10   : > { %p1076_p10 = pnand %p658_p7, %p174_p8  ;;  %s147_s9 = ssub.s32 %s969_s24, %s1255_s29 }
  0x11   : > { %s1235_s7 = scalar_select %p1072_p9, 1, 0 }
  0x12   : > { %s1236_s8 = scalar_select %p1076_p10, 1, 0 }
  0x13   : > { %p148_p11 = scmp.eq.s32.totalorder %s147_s9, 0  ;;  %p752_p12 = pneg %p1076_p10 }
  0x14   : > { %p1084_p13 = scmp.eq.s32.totalorder %s656_s26, 0  ;;  %s975_s12 = smov [#allocation3]  }
  0x15   : > { %s1089_s11 = scalar_select %p148_p11, %s953_s20, %s150_s30  }
  0x16   : > { %s1237_s10 = scalar_select %p1084_p13, 1, 0 }
  0x17   : > { %s192_s13 = sshll.u32 %s975_s12, 4  ;;  %p1093_p0 = pnand %p1084_p13, %p752_p12  ;;  %s193_s13 = int_to_ptr.vmem [resolvable:$true] %s192_s13 }
  0x18   : > { %s847_s17 = scalar_lea.hbm %s1227_s3, 4096 }
  0x19   : > { %p848_p1 = scmp.ne.s32.totalorder %s1227_s3, %s847_s17  ;;  %p849_p2 = pneg %p1093_p0 }
  0x1a   : > { %p854_p6 = scmp.lt.u32.totalorder %s847_s17, %s1227_s3 }
  0x1b   : > { %p850_p4 = pnand %p849_p2, %p848_p1 }
  0x1d   : > { %p851_p5 = pneg %p850_p4 }
  0x1f   : > { %p856_p7 = pnand %p854_p6, %p851_p5 }
  0x21   : > { %859 = shalt.err (!%p856_p7)
}
  0x22   : > { %s860_s12 = scalar_lea.vmem %s193_s13, 4096  ;;  %p868_p9 = scmp.lt.s32.totalorder %s193_s13, %s193_s13 }
  0x23   : > { %p861_p8 = scmp.ne.s32.totalorder %s193_s13, %s860_s12  ;;  %p869_p3 = scmp.lt.s32.totalorder %s860_s12, %s860_s12 }
  0x25   : > { %p863_p11 = pnand %p861_p8, %p849_p2  ;;  %p870_p13 = por %p869_p3, %p868_p9 }
  0x27   : > { %p864_p12 = pneg %p863_p11 }
  0x29   : > { %p871_p10 = pnand %p870_p13, %p864_p12 }
  0x2b   : > { %874 = shalt.err (!%p871_p10)
}
  0x2c   : > { %s976_s15 = smov 128   ;;  %s977_s16 = smov 8  }
  0x2d   : > { %755 = dma.hbm_to_vmem [thread:$0]  (!%p1093_p0), %s1227_s3, 4096, %s193_s13, [#allocation4], %s976_s15, %s976_s15, %s977_s16  }
  0x2e   : > { %p1239_p1 = scmp.ne.s32.totalorder %s1236_s8, 0 }
  0x2f   : > { %p1240_p4 = scmp.ne.s32.totalorder (!%p1239_p1), %s1237_s10, 0 }
  0x30   : > { %224 = sbr.rel (%p1239_p1) target bundleno = 608 (0x260), region = 40 }
  0x37   : > { %936 = dma.done.wait (%p1240_p4), [#allocation4], 4096  }
  0x38   : > { %938 = vsyncadd (%p1240_p4), [#allocation4], 4294963200  ;;  %s253_s17 = sand.u32 1, %s949_s19   ;;  %s663_s14 = sshll.u32 %s957_s21, 1 }
  0x39   : > { %p256_p3 = scmp.lt.s32.totalorder %s961_s22, 1  ;;  %p258_p9 = scmp.lt.s32.totalorder %s663_s14, 7 }
  0x3a   : > { %s1128_s10 = scalar_lea.vmem [#allocation6], %s253_s17  ;;  %p666_p10 = scmp.ne.s32.totalorder %s957_s21, 0 }
  0x3b   : > { %s257_s30 = scalar_select %p256_p3, %s961_s22, 1 }
  0x3c   : > { %s1257_s14 = smov (!%p258_p9, %s663_s14), 7  ;;  %269 = sbr.rel (%p666_p10) target bundleno = 67 (0x43), region = 48 }
  0x3d   : > { %s664_s13 = sshll.u32 %s257_s30, 3  ;;  %v270_v0 = vlaneseq (!%p666_p10)  ;;  %v978_v1 = vmov (!%p666_p10), 0.0  }
  0x3e   : > { %s261_s8 = sadd.s32 %s664_s13, %s1257_s14 }
  0x3f   : > { %s665_s9 = sshll.u32 %s261_s8, 2  ;;  %vm272_vm0 = vcmp.lt.s32.totalorder (!%p666_p10), %v270_v0, 256 }
  0x40   : > { %s263_s16 = scalar_lea.vmem %s1224_s0, %s665_s9  ;;  %274 = vst.msk [vmem:[#allocation2] sm:$0x3] (!%p666_p10), %vm272_vm0, %v978_v1 }
  0x43 PF: > { %v833_v2 = vld [vmem:[%s1225_s1 + $0x4] ss:$8 sps:$4 sm:$0xff]   ;;  %v835_v3 = vld [vmem:[%s1225_s1] ss:$8 sps:$4 sm:$0xff]   ;;  %v979_v4 = vmov 0   ;;  %vm330_vm1 = vcmask 392192   ;;  %v285_v10 = vlaneseq }
  0x44   : > { %366 = vmatprep.mubr.bf16.mxu0 %v979_v4  ;;  %334 = vmatprep.subr.bf16.mxu0 %v833_v2  ;;  %v836_v5 = vld [vmem:[%s1225_s1 + $0x14] ss:$8 sps:$4 sm:$0xff]   ;;  %v838_v6 = vld [vmem:[%s1225_s1 + $0x10] ss:$8 sps:$4 sm:$0xff]   ;;  %v839_v7 = vld [vmem:[%s1225_s1 + $0x24] ss:$8 sps:$4 sm:$0xff]  }
  0x45   : > { %335 = vmatpush1.bf16.msra.mxu0 %v835_v3  ;;  %v841_v8 = vld [vmem:[%s1225_s1 + $0x20] ss:$8 sps:$4 sm:$0xff]   ;;  %v1149_v11 = vshrl.u32 %v285_v10, 7  ;;  %v980_v53 = vmov 1966171168   ;;  %vm435_vm2 = vcmp.lt.s32.totalorder %v285_v10, 256 }
  0x46   : > { %336 = vmatprep.subr.bf16.mxu0 %v836_v5  ;;  %v842_v9 = vld [vmem:[%s263_s16] sm:$0xff]   ;;  %v418_v54 = vunpack.c.l.s4 %v980_v53  ;;  %p675_p13 = scmp.ne.s32.totalorder %s957_s21, 3 }
  0x47   : > { %v287_v12 = vsub.s32 0, %v1149_v11  ;;  %v283_v13 = vld [vmem:[%s1226_s2] sm:$0x3]  ;;  %v291_v14 = vsub.s32 1, %v1149_v11  ;;  %v474_v53 = vld [vmem:[#allocation3 + $0xf0] sm:$0xff] (!%p675_p13) }
  0x48   : > { %v419_v58 = vunpack.c.0.s8 %v418_v54  ;;  %v399_v3 = vld [vmem:[#allocation2] sm:$0x3] }
  0x49   : > { %337 = vmatpush1.bf16.msra.mxu0 %v838_v6  ;;  %v288_v15 = vrot.slane %v283_v13, %v287_v12  ;;  %v292_v16 = vrot.slane %v283_v13, %v291_v14  ;;  %v460_v6 = vld [vmem:[#allocation3 + $0x80] sm:$0xff] (!%p675_p13)  ;;  %v445_v13 = vld [vmem:[#allocation3 + $0x8] sm:$0xff] (!%p675_p13)  ;;  %v475_v54 = vld [vmem:[#allocation3 + $0xf8] sm:$0xff] (!%p675_p13) }
  0x4a   : > { %338 = vmatprep.subr.bf16.mxu0 %v839_v7  ;;  %v422_v62 = vsub.s32 %v419_v58, %v1149_v11  ;;  %v461_v7 = vld [vmem:[#allocation3 + $0x88] sm:$0xff] (!%p675_p13) }
  0x4d   : > { %339 = vmatpush1.bf16.msra.mxu0 %v841_v8  ;;  %v444_v8 = vld [vmem:[#allocation3] sm:$0xff] (!%p675_p13) }
  0x50   : > { %674 = vmatmul.mubr.msk.bf16.vlgmr.msra.gmra.mrb[0].mxu0 %vm330_vm1, %v842_v9  ;;  %v714_v9 = vpack.c.bf16 (!%p675_p13), %v461_v7, %v460_v6 }
  0x52   : > { %715 = vmatprep.subr.bf16.mxu0 (!%p675_p13), %v714_v9 }
 0x123   : > { %v368_v17 = vpop.f32.mrb[0].mxu0 }
 0x124   : > { %v369_v18 = vadd.f32 %v368_v17, %v288_v15  ;;  %v370_v19 = vpop.f32.mrb[1].mxu0  ;;  %v716_v17 = vpack.c.bf16 (!%p675_p13), %v445_v13, %v444_v8 }
 0x125   : > { %v371_v20 = vadd.f32 %v370_v19, %v292_v16  ;;  %v372_v21 = vpop.f32.mrb[2].mxu0  ;;  %v446_v19 = vld [vmem:[#allocation3 + $0x10] sm:$0xff] (!%p675_p13) }
 0x126   : > { %v377_v22 = vmax.f32 %v369_v18, 0.0  ;;  %v373_v23 = vadd.f32 %v372_v21, %v288_v15  ;;  %v374_v24 = vpop.f32.mrb[3].mxu0  ;;  %v462_v15 = vld [vmem:[#allocation3 + $0x90] sm:$0xff] (!%p675_p13)  ;;  %v464_v21 = vld [vmem:[#allocation3 + $0xa0] sm:$0xff] (!%p675_p13)  ;;  %717 = vmatpush3.bf16.msra.mxu0 (!%p675_p13), %v716_v17 }
 0x127   : > { %v381_v25 = vmul.f32 %v371_v20, %v371_v20  ;;  %v375_v26 = vadd.f32 %v374_v24, %v292_v16  ;;  %v463_v16 = vld [vmem:[#allocation3 + $0x98] sm:$0xff] (!%p675_p13)  ;;  %v448_v24 = vld [vmem:[#allocation3 + $0x20] sm:$0xff] (!%p675_p13) }
 0x128   : > { %v378_v27 = vmax.f32 %v373_v23, 0.0  ;;  %v379_v30 = vmin.f32 %v377_v22, 6.0  ;;  %v718_v18 = vpack.c.bf16 (!%p675_p13), %v463_v16, %v462_v15  ;;  %v465_v22 = vld [vmem:[#allocation3 + $0xa8] sm:$0xff] (!%p675_p13) }
 0x129   : > { %v383_v28 = vmul.f32 %v381_v25, %v371_v20  ;;  %v382_v29 = vmul.f32 %v375_v26, %v375_v26  ;;  %v722_v23 = vpack.c.bf16 (!%p675_p13), %v465_v22, %v464_v21  ;;  %v449_v25 = vld [vmem:[#allocation3 + $0x28] sm:$0xff] (!%p675_p13) }
 0x12a   : > { %v380_v31 = vmin.f32 %v378_v27, 6.0  ;;  %719 = vmatprep.subr.bf16.mxu0 (!%p675_p13), %v718_v18  ;;  %v467_v27 = vld [vmem:[#allocation3 + $0xb8] sm:$0xff] (!%p675_p13) }
 0x12b   : > { %v385_v32 = vmul.f32 0.044715, %v383_v28  ;;  %v384_v33 = vmul.f32 %v382_v29, %v375_v26  ;;  %v724_v28 = vpack.c.bf16 (!%p675_p13), %v449_v25, %v448_v24 }
 0x12c   : > { %v400_v34 = vadd.f32 %v380_v31, %v379_v30  ;;  %v450_v30 = vld [vmem:[#allocation3 + $0x30] sm:$0xff] (!%p675_p13)  ;;  %v451_v31 = vld [vmem:[#allocation3 + $0x38] sm:$0xff] (!%p675_p13) }
 0x12d   : > { %v387_v35 = vadd.f32 %v385_v32, %v371_v20  ;;  %v386_v36 = vmul.f32 0.044715, %v384_v33  ;;  %v468_v32 = vld [vmem:[#allocation3 + $0xc0] sm:$0xff] (!%p675_p13)  ;;  %v469_v33 = vld [vmem:[#allocation3 + $0xc8] sm:$0xff] (!%p675_p13) }
 0x12e   : > { %v401_v42 = vrot.slane %v400_v34, 4 }
 0x12f   : > { %v389_v37 = vmul.f32 0.7978846, %v387_v35  ;;  %v388_v38 = vadd.f32 %v386_v36, %v375_v26  ;;  %v728_v36 = vpack.c.bf16 (!%p675_p13), %v451_v31, %v450_v30 }
 0x130   : > { %v402_v46 = vadd.f32 %v401_v42, %v400_v34  ;;  %v471_v42 = vld [vmem:[#allocation3 + $0xd8] sm:$0xff] (!%p675_p13) }
 0x131   : > { %843 = vtanh.f32 %v389_v37  ;;  %v390_v39 = vmul.f32 0.7978846, %v388_v38  ;;  %v730_v37 = vpack.c.bf16 (!%p675_p13), %v469_v33, %v468_v32  ;;  %v452_v38 = vld [vmem:[#allocation3 + $0x40] sm:$0xff] (!%p675_p13) }
 0x132   : > { %v403_v50 = vrot.slane %v402_v46, 2 }
 0x133   : > { %845 = vtanh.f32 %v390_v39  ;;  %v453_v39 = vld [vmem:[#allocation3 + $0x48] sm:$0xff] (!%p675_p13) }
 0x134   : > { %v404_v55 = vadd.f32 %v403_v50, %v402_v46  ;;  %v455_v46 = vld [vmem:[#allocation3 + $0x58] sm:$0xff] (!%p675_p13) }
 0x136   : > { %v405_v59 = vrot.slane %v404_v55, 1 }
 0x138   : > { %v406_v63 = vadd.f32 %v405_v59, %v404_v55  ;;  %v742_v55 = vpack.c.bf16 (!%p675_p13), %v475_v54, %v474_v53 }
 0x13b   : > { %v844_v40 = vpop.eup %843 }
 0x13c   : > { %v393_v41 = vadd.f32 1.0, %v844_v40 }
 0x13d   : > { %v846_v43 = vpop.eup %845 }
 0x13e   : > { %v395_v44 = vmul.f32 0.5, %v393_v41  ;;  %v394_v45 = vadd.f32 1.0, %v846_v43  ;;  %v470_v41 = vld [vmem:[#allocation3 + $0xd0] sm:$0xff] (!%p675_p13)  ;;  %v732_v43 = vpack.c.bf16 (!%p675_p13), %v453_v39, %v452_v38 }
 0x140   : > { %v396_v47 = vmul.f32 0.5, %v394_v45  ;;  %v397_v48 = vmul.f32 %v395_v44, %v371_v20  ;;  %v447_v20 = vld [vmem:[#allocation3 + $0x18] sm:$0xff] (!%p675_p13)  ;;  %v734_v44 = vpack.c.bf16 (!%p675_p13), %v471_v42, %v470_v41  ;;  %v454_v45 = vld [vmem:[#allocation3 + $0x50] sm:$0xff] (!%p675_p13) }
 0x141   : > { %v720_v10 = vpack.c.bf16 (!%p675_p13), %v447_v20, %v446_v19 }
 0x142   : > { %v398_v49 = vmul.f32 %v396_v47, %v375_v26  ;;  %v466_v26 = vld [vmem:[#allocation3 + $0xb0] sm:$0xff] (!%p675_p13)  ;;  %v472_v47 = vld [vmem:[#allocation3 + $0xe0] sm:$0xff] (!%p675_p13) }
 0x143   : > { %721 = vmatpush3.bf16.msra.mxu0 (!%p675_p13), %v720_v10  ;;  %v726_v29 = vpack.c.bf16 (!%p675_p13), %v467_v27, %v466_v26 }
 0x144   : > { %v407_v51 = vadd.f32 %v398_v49, %v397_v48  ;;  %723 = vmatprep.subr.bf16.mxu0 (!%p675_p13), %v722_v23  ;;  %v473_v48 = vld [vmem:[#allocation3 + $0xe8] sm:$0xff] (!%p675_p13)  ;;  %v736_v49 = vpack.c.bf16 (!%p675_p13), %v455_v46, %v454_v45 }
 0x145   : > { %v738_v50 = vpack.c.bf16 (!%p675_p13), %v473_v48, %v472_v47 }
 0x146   : > { %v408_v52 = vrot.slane %v407_v51, 4 }
 0x147   : > { %725 = vmatpush3.bf16.msra.mxu0 (!%p675_p13), %v724_v28 }
 0x148   : > { %v409_v56 = vadd.f32 %v408_v52, %v407_v51  ;;  %727 = vmatprep.subr.bf16.mxu0 (!%p675_p13), %v726_v29  ;;  %v456_v51 = vld [vmem:[#allocation3 + $0x60] sm:$0xff] (!%p675_p13)  ;;  %v457_v52 = vld [vmem:[#allocation3 + $0x68] sm:$0xff] (!%p675_p13) }
 0x14a   : > { %v410_v57 = vrot.slane %v409_v56, 2 }
 0x14b   : > { %729 = vmatpush3.bf16.msra.mxu0 (!%p675_p13), %v728_v36 }
 0x14c   : > { %v411_v60 = vadd.f32 %v410_v57, %v409_v56  ;;  %731 = vmatprep.subr.bf16.mxu0 (!%p675_p13), %v730_v37  ;;  %v458_v56 = vld [vmem:[#allocation3 + $0x70] sm:$0xff] (!%p675_p13)  ;;  %v459_v57 = vld [vmem:[#allocation3 + $0x78] sm:$0xff] (!%p675_p13) }
 0x14d   : > { %v744_v58 = vpack.c.bf16 (!%p675_p13), %v459_v57, %v458_v56 }
 0x14e   : > { %v412_v61 = vrot.slane %v411_v60, 1 }
 0x14f   : > { %733 = vmatpush3.bf16.msra.mxu0 (!%p675_p13), %v732_v43 }
 0x150   : > { %v413_v0 = vadd.f32 %v412_v61, %v411_v60  ;;  %735 = vmatprep.subr.bf16.mxu0 (!%p675_p13), %v734_v44  ;;  %v476_v61 = vld [vmem:[%s1228_s4] sm:$0x1] (!%p675_p13) }
 0x152   : > { %v416_v1 = vcombine.low %v406_v63, %v413_v0 }
 0x153   : > { %737 = vmatpush3.bf16.msra.mxu0 (!%p675_p13), %v736_v49 }
 0x154   : > { %v423_v2 = vrot.slane %v416_v1, %v422_v62  ;;  %441 = sbr.rel (%p675_p13) target bundleno = 583 (0x247), region = 52  ;;  %739 = vmatprep.subr.bf16.mxu0 (!%p675_p13), %v738_v50 }
 0x156   : > { %v430_v4 = vrot.slane %v423_v2, %v422_v62 }
 0x158   : > { %v432_v5 = vadd.f32 %v430_v4, %v399_v3 }
 0x15a   : > { %437 = vst.msk [vmem:[#allocation2] sm:$0x3] %vm435_vm2, %v432_v5 }
 0x161   : > { %v442_v34 = vld [vmem:[#allocation2] sm:$0x3] }
 0x162   : > { %v443_v35 = vmul.f32 0.015625, %v442_v34 }
 0x164   : > { %v485_v40 = vrot.slane %v443_v35, %v291_v14  ;;  %v740_v14 = vpack.c.bf16 %v457_v52, %v456_v51  ;;  %v481_v59 = vrot.slane %v443_v35, %v287_v12 }
 0x166   : > { %552 = vmatprep.mubr.f32.mxu0 %v485_v40  ;;  %741 = vmatpush3.bf16.msra.mxu0 %v740_v14 }
 0x167   : > { %743 = vmatprep.subr.bf16.mxu0 %v742_v55 }
 0x16a   : > { %745 = vmatpush3.bf16.msra.mxu0 %v744_v58 }
 0x16d   : > { %553 = vmatmul.mubr.f32.vlgmr.msra.gmra.mrb[0].mxu0 %v481_v59 }
 0x240   : > { %v711_v60 = vpop.f32.mrb[0].mxu0 }
 0x241   : > { %v712_v62 = vpop.f32.mrb[1].mxu0 }
 0x242   : > { %v713_v63 = vadd.f32 %v712_v62, %v711_v60 }
 0x244   : > { %v555_v0 = vadd.f32 %v713_v63, %v476_v61 }
 0x246   : > { %558 = vst [vmem:[%s1128_s10] sm:$0x1] %v555_v0 }
 0x247 PF: > { %s676_s8 = sshll.u32 %s961_s22, 4  ;;  %s572_s26 = sshll.u32 %s1128_s10, 4  ;;  %s573_s26 = int_to_ptr.vmem [resolvable:$true] %s572_s26 }
 0x248   : > { %s1174_s15 = scalar_lea.hbm %s1229_s5, %s676_s8  ;;  %s560_s27 = scalar_lea.sflag [#allocation5], %s253_s17 }
 0x249   : > { %s875_s14 = scalar_lea.vmem %s573_s26, 16  ;;  %p1241_p2 = scmp.ne.s32.totalorder %s1234_s6, 0 }
 0x24a   : > { %p876_p0 = scmp.ne.s32.totalorder %s573_s26, %s875_s14  ;;  %s981_s30 = smov [#allocation6]  }
 0x24b   : > { %s879_s13 = sshll.u32 %s981_s30, 4  ;;  %s880_s13 = int_to_ptr.vmem [resolvable:$false] %s879_s13 }
 0x24c   : > { %p877_p5 = pnand %p876_p0, %p1241_p2  ;;  %s881_s21 = scalar_lea.vmem %s880_s13, 32 }
 0x24d   : > { %p882_p7 = scmp.lt.s32.totalorder %s573_s26, %s880_s13  ;;  %p883_p8 = scmp.lt.s32.totalorder %s881_s21, %s875_s14 }
 0x24e   : > { %p878_p6 = pneg %p877_p5 }
 0x24f   : > { %p884_p11 = por %p883_p8, %p882_p7 }
 0x251   : > { %p885_p12 = pnand %p884_p11, %p878_p6 }
 0x253   : > { %888 = shalt.err (!%p885_p12)
}
 0x254   : > { %s889_s22 = scalar_lea.hbm %s1174_s15, 16  ;;  %s893_s16 = scalar_lea.hbm %s1229_s5, 32 }
 0x255   : > { %p890_p1 = scmp.ne.s32.totalorder %s1174_s15, %s889_s22  ;;  %p894_p9 = scmp.lt.u32.totalorder %s1174_s15, %s1229_s5 }
 0x256   : > { %p895_p10 = scmp.lt.u32.totalorder %s893_s16, %s889_s22  ;;  %p897_p0 = scmp.lt.u32.totalorder %s889_s22, %s1174_s15 }
 0x257   : > { %p891_p4 = pnand %p890_p1, %p1241_p2 }
 0x258   : > { %p896_p13 = por %p895_p10, %p894_p9 }
 0x259   : > { %p892_p3 = pneg %p891_p4 }
 0x25a   : > { %p898_p5 = por %p897_p0, %p896_p13 }
 0x25c   : > { %p899_p6 = pnand %p898_p5, %p892_p3 }
 0x25e   : > { %902 = shalt.err (!%p899_p6)
}
 0x25f   : > { %750 = dma.vmem_to_hbm [thread:$0]  (%p1241_p2), %s573_s26, 16, %s1174_s15, %s560_s27  }
 0x260 PF: > { %p762_p7 = scmp.ge.s32.totalorder %s973_s25, 2  ;;  %s584_s12 = sand.u32 1, %s945_s18  }
 0x261   : > { %p1242_p8 = scmp.ne.s32.totalorder %s1235_s7, 0  ;;  %s585_s14 = scalar_lea.sflag [#allocation5], %s584_s12 }
 0x263   : > { %p757_p11 = pnand %p762_p7, %p1242_p8 }
 0x265   : > { %940 = dma.done.wait (!%p757_p11), %s585_s14, 16  }
 0x266   : > { %942 = vsyncadd (!%p757_p11), %s585_s14, 4294967280  ;;  %s19_s25 = sadd.s32 1, %s973_s25   ;;  %s1243_s18 = smov %s949_s19 }
 0x267   : > { %p16_p12 = scmp.ge.s32.totalorder %s19_s25, 10   ;;  %s1244_s19 = smov %s953_s20 }
 0x268   : > { %s1245_s20 = smov %s1089_s11  ;;  %s1246_s21 = smov %s965_s23 }
 0x269   : > { %s1247_s22 = smov %s969_s24  ;;  %s1248_s23 = smov %s1251_s28 }
 0x26a   : > { %s1249_s24 = smov %s1255_s29  ;;  %18 = sbr.rel (!%p16_p12) target bundleno = 6 (0x6), region = 88 }
 0x271   :  { %589 = vsyncpa [#allocation4], 1 }
 0x272   :  { %591 = vsyncpa [#allocation4 + $0x1], 1 }
 0x273   :  { %592 = vsyncpa [#allocation5], 1 }
 0x274   :  { %594 = vsyncpa [#allocation5 + $0x1], 1 }

</bundles_post_ra>
